<compile_context>
chip_gen: v5e
topology: v5e:2x2
jax: 0.10.0
libtpu: 0.0.40
codegen_flags: <defaults>
</compile_context>

<pallas_src>
import jax
import jax.numpy as jnp
from jax.experimental import pallas as pl
from jax.experimental.pallas import tpu as pltpu

IN_DIM = 30
HID_DIM = 8
OUT_DIM = 1


def _mlp_kernel(x_ref, w1_ref, b1_ref, w2_ref, b2_ref, o_ref):
    # x_ref: (TB, 30), w1_ref: (30, 8), b1_ref: (1, 8),
    # w2_ref: (1, 8),  b2_ref: (1, 1),  o_ref: (TB, 1)
    x = x_ref[...]
    # Layer 1 on the MXU, f32 accumulation; bias add via implicit broadcast.
    h = jnp.dot(x, w1_ref[...], preferred_element_type=jnp.float32) + b1_ref[...]
    h = jnp.tanh(h)  # EUP
    # Layer 2 (8 -> 1) on VPU (broadcast multiply) + XLU (lane reduce):
    # avoids wasting an MXU push/pop on an N=1, K=8 matmul every grid step.
    y = jnp.sum(h * w2_ref[...], axis=-1, keepdims=True) + b2_ref[...]
    o_ref[...] = y.astype(o_ref.dtype)


def naive_fully_connected_forward(x, w1, b1, w2_row, b2, *, tb=8192):
    """x: (B, 30) float32. Returns (B, 1) float32.

    tb: batch tile size (rows per grid step). Must be a multiple of 8; when
        B <= tb the whole batch is a single full-extent block.
    """
    assert tb % 8 == 0, "tb must be a multiple of 8"
    B = x.shape[0]
    # Full-extent block for small batches (allowed regardless of divisibility);
    # otherwise fixed multiple-of-8 tile, Pallas handles the partial last block.
    TB = B if B <= tb else tb
    nb = pl.cdiv(B, TB)

    # Advisory cost hint: the kernel is HBM-bandwidth bound (~124 B/row).
    cost = pl.CostEstimate(
        flops=int(B * (2 * IN_DIM * HID_DIM + 2 * HID_DIM)),
        transcendentals=int(B * HID_DIM),
        bytes_accessed=int(
            B * (IN_DIM + OUT_DIM) * 4
            + (IN_DIM * HID_DIM + 2 * HID_DIM + 1) * 4
        ),
    )

    return pl.pallas_call(
        _mlp_kernel,
        out_shape=jax.ShapeDtypeStruct((B, OUT_DIM), jnp.float32),
        grid=(nb,),
        in_specs=[
            pl.BlockSpec((TB, IN_DIM), lambda i: (i, 0)),       # x: streamed per step
            pl.BlockSpec((IN_DIM, HID_DIM), lambda i: (0, 0)),  # w1: VMEM-resident
            pl.BlockSpec((1, HID_DIM), lambda i: (0, 0)),       # b1
            pl.BlockSpec((1, HID_DIM), lambda i: (0, 0)),       # w2 row
            pl.BlockSpec((1, OUT_DIM), lambda i: (0, 0)),       # b2
        ],
        out_specs=pl.BlockSpec((TB, OUT_DIM), lambda i: (i, 0)),
        compiler_params=pltpu.CompilerParams(
            dimension_semantics=("parallel",),      # megacore sharding on v7x
            vmem_limit_bytes=64 * 1024 * 1024,      # room for TB=8192 double buffers
        ),
        cost_estimate=cost,
    )(x, w1, b1, w2_row, b2)


def init_params(key):
    """Deterministic init matching nn.Linear default (uniform +/- 1/sqrt(fan_in))."""
    k1, k2, k3, k4 = jax.random.split(key, 4)
    lim1 = 1.0 / jnp.sqrt(jnp.float32(IN_DIM))
    lim2 = 1.0 / jnp.sqrt(jnp.float32(HID_DIM))
    w1 = jax.random.uniform(k1, (IN_DIM, HID_DIM), jnp.float32, -lim1, lim1)
    b1 = jax.random.uniform(k2, (1, HID_DIM), jnp.float32, -lim1, lim1)
    w2_row = jax.random.uniform(k3, (1, HID_DIM), jnp.float32, -lim2, lim2)
    b2 = jax.random.uniform(k4, (1, OUT_DIM), jnp.float32, -lim2, lim2)
    return w1, b1, w2_row, b2


# TODO(synk): the `lmv` LinearModelGraph circles/lines outputs have no defined
# semantics here (external module); only self.model(x) is implemented.

if __name__ == "__main__":
    key = jax.random.PRNGKey(0)
    kx, kp = jax.random.split(key)
    w1, b1, w2_row, b2 = init_params(kp)

    # Small primary check (single full-extent block).
    B = 8
    x = jax.random.normal(kx, (B, IN_DIM), jnp.float32)
    y = naive_fully_connected_forward(x, w1, b1, w2_row, b2)
    jax.block_until_ready(y)
    y_ref = jnp.tanh(x @ w1 + b1) @ w2_row.T + b2
    assert y.shape == (B, OUT_DIM)
    assert jnp.allclose(y, y_ref, atol=1e-5), "mismatch vs reference (B=8)"

    # Exercise the pipelined multi-step grid + partial last block path.
    B2 = 200  # 200 = 3*64 + 8 -> partial last tile with tb=64
    x2 = jax.random.normal(jax.random.PRNGKey(1), (B2, IN_DIM), jnp.float32)
    y2 = naive_fully_connected_forward(x2, w1, b1, w2_row, b2, tb=64)
    jax.block_until_ready(y2)
    y2_ref = jnp.tanh(x2 @ w1 + b1) @ w2_row.T + b2
    assert y2.shape == (B2, OUT_DIM)
    assert jnp.allclose(y2, y2_ref, atol=1e-5), "mismatch vs reference (B=200, tb=64)"

    print("KERNEL_OK")
</pallas_src>

<mosaic_0001>
module attributes {stable_mosaic.version = 11 : i64} {
  func.func @_mlp_kernel(%arg0: i32, %arg1: memref<8x30xf32, #tpu.memory_space<vmem>>, %arg2: memref<30x8xf32, #tpu.memory_space<vmem>>, %arg3: memref<1x8xf32, #tpu.memory_space<vmem>>, %arg4: memref<1x8xf32, #tpu.memory_space<vmem>>, %arg5: memref<1x1xf32, #tpu.memory_space<vmem>>, %arg6: memref<8x1xf32, #tpu.memory_space<vmem>>) attributes {dimension_semantics = [#tpu.dimension_semantics<parallel>], iteration_bounds = array<i64: 1>, scalar_prefetch = 0 : i64, scratch_operands = 0 : i64, tpu.core_type = #tpu.core_type<tc>, window_params = [{transform_indices = @transform_0, window_bounds = array<i64: 8, 30>}, {pipeline_mode = #tpu.pipeline_mode<synchronous>, transform_indices = @transform_1, window_bounds = array<i64: 30, 8>}, {pipeline_mode = #tpu.pipeline_mode<synchronous>, transform_indices = @transform_2, window_bounds = array<i64: 1, 8>}, {pipeline_mode = #tpu.pipeline_mode<synchronous>, transform_indices = @transform_3, window_bounds = array<i64: 1, 8>}, {pipeline_mode = #tpu.pipeline_mode<synchronous>, transform_indices = @transform_4, window_bounds = array<i64: 1, 1>}, {transform_indices = @transform_5, window_bounds = array<i64: 8, 1>}]} {
    %c0 = arith.constant 0 : index
    %c0_0 = arith.constant 0 : index
    %0 = vector.load %arg1[%c0, %c0_0] : memref<8x30xf32, #tpu.memory_space<vmem>>, vector<8x30xf32>
    %c0_1 = arith.constant 0 : index
    %c0_2 = arith.constant 0 : index
    %1 = vector.load %arg2[%c0_1, %c0_2] : memref<30x8xf32, #tpu.memory_space<vmem>>, vector<30x8xf32>
    %cst = arith.constant dense<0.000000e+00> : vector<8x8xf32>
    %2 = tpu.matmul %0, %1, %cst {dimension_numbers = #tpu.dot_dimension_numbers<[1], [0], [0], [1], [0, 0, 1, 1], [], []>} : vector<8x30xf32>, vector<30x8xf32>, vector<8x8xf32> -> vector<8x8xf32>
    %c0_3 = arith.constant 0 : index
    %c0_4 = arith.constant 0 : index
    %3 = vector.load %arg3[%c0_3, %c0_4] : memref<1x8xf32, #tpu.memory_space<vmem>>, vector<1x8xf32>
    %4 = vector.broadcast %3 : vector<1x8xf32> to vector<8x8xf32>
    %5 = arith.addf %2, %4 : vector<8x8xf32>
    %6 = math.tanh %5 : vector<8x8xf32>
    %c0_5 = arith.constant 0 : index
    %c0_6 = arith.constant 0 : index
    %7 = vector.load %arg4[%c0_5, %c0_6] : memref<1x8xf32, #tpu.memory_space<vmem>>, vector<1x8xf32>
    %8 = vector.broadcast %7 : vector<1x8xf32> to vector<8x8xf32>
    %9 = arith.mulf %6, %8 : vector<8x8xf32>
    %cst_7 = arith.constant dense<0.000000e+00> : vector<8xf32>
    %10 = vector.multi_reduction <add>, %9, %cst_7 [1] : vector<8x8xf32> to vector<8xf32>
    %11 = vector.shape_cast %10 : vector<8xf32> to vector<8x1xf32>
    %c0_8 = arith.constant 0 : index
    %c0_9 = arith.constant 0 : index
    %12 = vector.load %arg5[%c0_8, %c0_9] : memref<1x1xf32, #tpu.memory_space<vmem>>, vector<1x1xf32>
    %13 = vector.broadcast %12 : vector<1x1xf32> to vector<8x1xf32>
    %14 = arith.addf %11, %13 : vector<8x1xf32>
    %c0_10 = arith.constant 0 : index
    %c0_11 = arith.constant 0 : index
    %15 = vector.load %arg6[%c0_10, %c0_11] : memref<8x1xf32, #tpu.memory_space<vmem>>, vector<8x1xf32>
    tpu.vector_store %arg6[%c0_10, %c0_11], %14 {strides = array<i32>} : memref<8x1xf32, #tpu.memory_space<vmem>>, vector<8x1xf32>,
    return
  }
  func.func @transform_0(%arg0: i32) -> (i32, i32) {
    %c0_i32 = arith.constant 0 : i32
    %c0_i32_0 = arith.constant 0 : i32
    return %arg0, %c0_i32 : i32, i32
  }
  func.func @transform_1(%arg0: i32) -> (i32, i32) {
    %c0_i32 = arith.constant 0 : i32
    %c0_i32_0 = arith.constant 0 : i32
    %c0_i32_1 = arith.constant 0 : i32
    return %c0_i32, %c0_i32_0 : i32, i32
  }
  func.func @transform_2(%arg0: i32) -> (i32, i32) {
    %c0_i32 = arith.constant 0 : i32
    %c0_i32_0 = arith.constant 0 : i32
    %c0_i32_1 = arith.constant 0 : i32
    return %c0_i32, %c0_i32_0 : i32, i32
  }
  func.func @transform_3(%arg0: i32) -> (i32, i32) {
    %c0_i32 = arith.constant 0 : i32
    %c0_i32_0 = arith.constant 0 : i32
    %c0_i32_1 = arith.constant 0 : i32
    return %c0_i32, %c0_i32_0 : i32, i32
  }
  func.func @transform_4(%arg0: i32) -> (i32, i32) {
    %c0_i32 = arith.constant 0 : i32
    %c0_i32_0 = arith.constant 0 : i32
    %c0_i32_1 = arith.constant 0 : i32
    return %c0_i32, %c0_i32_0 : i32, i32
  }
  func.func @transform_5(%arg0: i32) -> (i32, i32) {
    %c0_i32 = arith.constant 0 : i32
    %c0_i32_0 = arith.constant 0 : i32
    return %arg0, %c0_i32 : i32, i32
  }
}

</mosaic_0001>

<bundles_post_ra>
// kernel: tpu_custom_call.1
= control target key start
LH: loop header
LB: loop body
LE: loop exit
PB: predicated region body
PF: predicated region fallthrough
CT: control target
= control target key end

     0   :  { %vm35_vm0 = vcmask 1045504   ;;  %vm31_vm1 = vcmask 244736   ;;  %vm65_vm2 = vcmask 64512   ;;  %vm74_vm3 = vcmask 7168   ;;  %s144_s1 = inlined_call_operand.vmem [shape: f32[30,8], index: 1, kind: input, shape index: {}]   ;;  %s145_s2 = inlined_call_operand.vmem [shape: f32[1,8], index: 2, kind: input, shape index: {}]   ;;  %s146_s0 = inlined_call_operand.vmem [shape: f32[8,30], index: 0, kind: input, shape index: {}]   ;;  %s147_s3 = inlined_call_operand.vmem [shape: f32[1,8], index: 3, kind: input, shape index: {}]   ;;  %s148_s4 = inlined_call_operand.<no memory space> [shape: f32[1,1], index: 4, kind: input, shape index: {}]   ;;  %s149_s5 = inlined_call_operand.vmem [shape: f32[8,1], index: 5, kind: output, shape index: {}]  }
   0x1   :  { %v26_v0 = vld [vmem:[%s144_s1 + $0x18] sm:$0x3f]  ;;  %v25_v1 = vld [vmem:[%s144_s1 + $0x10] sm:$0xff]  ;;  %v24_v2 = vld [vmem:[%s144_s1 + $0x8] sm:$0xff]  ;;  %v10_v5 = vstv %s148_s4 }
   0x2   :  { %80 = vmatpush.msk.msra.mxu0 %vm35_vm0, %v26_v0  ;;  %v23_v3 = vld [vmem:[%s144_s1] sm:$0xff]  ;;  %11 = vst [vmem:[#allocation2] sm:$0x1] %v10_v5 }
   0x3   :  { %v22_v4 = vld [vmem:[%s146_s0] sm:$0xff] }
   0x4   :  { %52 = vmatpush.msra.mxu0 %v25_v1  ;;  %v82_v6 = vld [vmem:[%s145_s2] ss:$0 sm:$0xff] }
   0x5   :  { %v83_v9 = vld [vmem:[%s147_s3] ss:$0 sm:$0xff] }
   0x6   :  { %53 = vmatpush.msra.mxu0 %v24_v2 }
   0x8   :  { %54 = vmatpush.msra.mxu0 %v23_v3 }
   0x9   :  { %81 = vmatmul.msk.f32.vlgmr.msra.gmra.mxu0 %vm31_vm1, %v22_v4  ;;  %v84_v13 = vld [vmem:[#allocation2] ss:$0 sm:$0xff] }
  0x86   :  { %v56_v7 = vpop.f32.mrf.mxu0 }
  0x87   :  { %v57_v8 = vadd.f32 %v82_v6, %v56_v7 }
  0x89   :  { %85 = vtanh.f32 %v57_v8 }
  0x8f   :  { %v86_v10 = vpop.eup %85 }
  0x90   :  { %v64_v11 = vmul.f32 %v86_v10, %v83_v9 }
  0x92   :  { %v66_v12 = vsel %vm65_vm2, %v64_v11, 0.0 }
  0x93   :  { %67 = vadd.xlane.f32.xlu0 %v66_v12 }
 0x106   :  { %v68_v14 = vpop.xlane.xlu0 %67 }
 0x107   :  { %v73_v15 = vadd.f32 %v84_v13, %v68_v14 }
 0x109   :  { %75 = vst.msk [vmem:[%s149_s5] sm:$0xff] %vm74_vm3, %v73_v15 }

</bundles_post_ra>
